<compile_context>
chip_gen: v7x
topology: tpu7x:2x2x1
jax: 0.10.0
libtpu: 0.0.40
codegen_flags: <defaults>
</compile_context>

<pallas_src>
import jax
import jax.numpy as jnp
from jax.experimental import pallas as pl
from jax.experimental.pallas import tpu as pltpu


def _round_up(x, m):
    return ((x + m - 1) // m) * m


# ----------------------------------------------------------------------------- kernel
def _make_level_kernel(mem_dim, n_max, b_blk):
    m = mem_dim

    def kernel(x_ref, cc_ref, ch_ref, wx_ref, bx_ref, wh_ref, out_ref):
        # Fused x projection: (b, 4m) = [iou_x | f_x], all biases folded in.
        xz = (jnp.dot(x_ref[...], wx_ref[...],
                      preferred_element_type=jnp.float32) + bx_ref[...])

        # Fused child projection: flatten children into the matmul M axis so the
        # MXU sees one (b*n_max, mem) @ (mem, 4*mem) matmul.
        ch_flat = ch_ref[...].reshape(b_blk * n_max, m)
        hz = jnp.dot(ch_flat, wh_ref[...], preferred_element_type=jnp.float32)
        hz = hz.reshape(b_blk, n_max, 4 * m)

        # iou = ioux(x) + iouh(sum_children child_h)    (distributivity)
        iou = xz[:, :3 * m] + jnp.sum(hz[:, :, :3 * m], axis=1)
        i_g = jax.nn.sigmoid(iou[:, :m])
        o_g = jax.nn.sigmoid(iou[:, m:2 * m])
        u_g = jnp.tanh(iou[:, 2 * m:])

        # f_n = sigmoid(fh(child_h_n) + fx(x)); padded child rows have child_c = 0
        # so they contribute nothing to the sum below (matches torch semantics).
        fx_b = jnp.expand_dims(xz[:, 3 * m:], 1)                  # (b, 1, m)
        f = jax.nn.sigmoid(hz[:, :, 3 * m:] + fx_b)               # (b, n_max, m)

        c = i_g * u_g + jnp.sum(f * cc_ref[...], axis=1)          # (b, m)
        h = o_g * jnp.tanh(c)

        # pack c|h into one lane-wider output slab
        out_ref[...] = jnp.concatenate([c, h], axis=1)

    return kernel


def _make_level_call(in_dim, mem_dim, n_max, b_blk, b_pad):
    kernel = _make_level_kernel(mem_dim, n_max, b_blk)
    grid = (b_pad // b_blk,)
    return pl.pallas_call(
        kernel,
        out_shape=jax.ShapeDtypeStruct((b_pad, 2 * mem_dim), jnp.float32),
        grid_spec=pltpu.PrefetchScalarGridSpec(
            num_scalar_prefetch=0,
            grid=grid,
            in_specs=[
                pl.BlockSpec((b_blk, in_dim), lambda i: (i, 0)),
                pl.BlockSpec((b_blk, n_max, mem_dim), lambda i: (i, 0, 0)),
                pl.BlockSpec((b_blk, n_max, mem_dim), lambda i: (i, 0, 0)),
                # weights / bias: same block every grid step -> stay resident in
                # VMEM, no per-step HBM re-DMA.
                pl.BlockSpec((in_dim, 4 * mem_dim), lambda i: (0, 0)),
                pl.BlockSpec((1, 4 * mem_dim), lambda i: (0, 0)),
                pl.BlockSpec((mem_dim, 4 * mem_dim), lambda i: (0, 0)),
            ],
            out_specs=pl.BlockSpec((b_blk, 2 * mem_dim), lambda i: (i, 0)),
        ),
        compiler_params=pltpu.CompilerParams(
            dimension_semantics=("parallel",)),   # shards node blocks on v7x's 2 TCs
    )


# ----------------------------------------------------------------------------- module
class Tree:
    def __init__(self, idx, children=()):
        self.idx = idx
        self.children = list(children)
        self.num_children = len(self.children)
        self.state = None


class ChildSumTreeLSTMPallas:
    def __init__(self, in_dim, mem_dim, params, n_max=8, b_blk=8):
        self.in_dim = in_dim
        self.mem_dim = mem_dim
        self.n_max = n_max
        self.b_blk = b_blk
        wioux, bioux, wiouh, biouh, wfx, bfx, wfh, bfh = params
        # Fuse 4 matmuls -> 2, fold all 4 biases into one vector on the x side.
        self.wx = jnp.concatenate([wioux, wfx], axis=1)            # (in_dim, 4m)
        self.wh = jnp.concatenate([wiouh, wfh], axis=1)            # (mem,    4m)
        self.bx = jnp.concatenate([bioux + biouh, bfx + bfh], axis=1)  # (1, 4m)
        # TODO(synk): on v6e/v7x cast wx/wh (and x/child_h) to bfloat16 with f32
        # accumulation for the fast MXU path; kept f32 here to hold 1e-5 tolerance.
        self._step_cache = {}

    def _level_step(self, b_pad):
        if b_pad in self._step_cache:
            return self._step_cache[b_pad]
        level_call = _make_level_call(self.in_dim, self.mem_dim, self.n_max,
                                      self.b_blk, b_pad)
        mem = self.mem_dim

        def step(inputs, c_tab, h_tab, x_idx, child_ids, node_ids, wx, bx, wh):
            x = inputs[x_idx]                       # (b_pad, in_dim) device gather
            cc = c_tab[child_ids]                   # (b_pad, n_max, mem)
            ch = h_tab[child_ids]
            out = level_call(x, cc, ch, wx, bx, wh)
            c_new = out[:, :mem]
            h_new = out[:, mem:]
            c_tab = c_tab.at[node_ids].set(c_new)   # scatter back into state table
            h_tab = h_tab.at[node_ids].set(h_new)
            return c_tab, h_tab

        jitted = jax.jit(step)
        self._step_cache[b_pad] = jitted
        return jitted

    def forward(self, tree, inputs):
        # Build a level-synchronous bottom-up schedule (pure Python: the tree
        # topology is data-dependent and has no static Pallas grid equivalent).
        nodes = []

        def visit(t):
            t.node_id = len(nodes)
            nodes.append(t)
            h = -1
            for c in t.children:
                visit(c)
                h = max(h, c.height)
            t.height = h + 1

        visit(tree)
        num_nodes = len(nodes)
        zero_row = num_nodes        # never written: zero state for padded child slots
        trash_row = num_nodes + 1   # scatter target for padded batch rows (never read)

        levels = {}
        for t in nodes:
            if t.num_children > self.n_max:
                raise ValueError("node has more children than n_max")
            levels.setdefault(t.height, []).append(t)

        c_tab = jnp.zeros((num_nodes + 2, self.mem_dim), jnp.float32)
        h_tab = jnp.zeros((num_nodes + 2, self.mem_dim), jnp.float32)

        for height in sorted(levels):
            lvl = levels[height]
            b = len(lvl)
            b_pad = _round_up(b, self.b_blk)

            x_idx = [t.idx for t in lvl] + [0] * (b_pad - b)
            node_ids = [t.node_id for t in lvl] + [trash_row] * (b_pad - b)
            child_ids = []
            for t in lvl:
                row = [c.node_id for c in t.children]
                row += [zero_row] * (self.n_max - len(row))
                child_ids.append(row)
            child_ids += [[zero_row] * self.n_max] * (b_pad - b)

            step = self._level_step(b_pad)
            c_tab, h_tab = step(inputs, c_tab, h_tab,
                                jnp.asarray(x_idx, jnp.int32),
                                jnp.asarray(child_ids, jnp.int32),
                                jnp.asarray(node_ids, jnp.int32),
                                self.wx, self.bx, self.wh)

        # expose per-node states like the PyTorch module
        for t in nodes:
            t.state = (c_tab[t.node_id:t.node_id + 1],
                       h_tab[t.node_id:t.node_id + 1])
        return tree.state


# ----------------------------------------------------------------------------- pure-JAX reference
def node_forward_ref(x, child_c, child_h, params):
    wioux, bioux, wiouh, biouh, wfx, bfx, wfh, bfh = params
    child_h_sum = jnp.sum(child_h, axis=0, keepdims=True)
    iou = x @ wioux + bioux + child_h_sum @ wiouh + biouh
    mem = bfx.shape[1]
    i = jax.nn.sigmoid(iou[:, :mem])
    o = jax.nn.sigmoid(iou[:, mem:2 * mem])
    u = jnp.tanh(iou[:, 2 * mem:])
    f = jax.nn.sigmoid(child_h @ wfh + bfh + (x @ wfx + bfx))
    c = i * u + jnp.sum(f * child_c, axis=0, keepdims=True)
    h = o * jnp.tanh(c)
    return c, h


def tree_forward_ref(tree, inputs, params, mem_dim):
    for child in tree.children:
        tree_forward_ref(child, inputs, params, mem_dim)
    if tree.num_children == 0:
        child_c = jnp.zeros((1, mem_dim), jnp.float32)
        child_h = jnp.zeros((1, mem_dim), jnp.float32)
    else:
        child_c = jnp.concatenate([c.ref_state[0] for c in tree.children], axis=0)
        child_h = jnp.concatenate([c.ref_state[1] for c in tree.children], axis=0)
    x = inputs[tree.idx:tree.idx + 1]
    tree.ref_state = node_forward_ref(x, child_c, child_h, params)
    return tree.ref_state


# ----------------------------------------------------------------------------- main
if __name__ == "__main__":
    in_dim, mem_dim = 32, 32
    seq = 8
    n_max = 8      # max children per node (zero-padded child slots)
    b_blk = 8      # node block per grid step (sublane multiple; raise to >=128 for real workloads)

    key = jax.random.PRNGKey(0)
    ks = jax.random.split(key, 9)

    def lin(kw, kb, fan_in, fan_out):
        bound = 1.0 / jnp.sqrt(fan_in)
        w = jax.random.uniform(kw, (fan_in, fan_out), jnp.float32, -bound, bound)
        b = jax.random.uniform(kb, (1, fan_out), jnp.float32, -bound, bound)
        return w, b

    wioux, bioux = lin(ks[0], ks[1], in_dim, 3 * mem_dim)
    wiouh, biouh = lin(ks[2], ks[3], mem_dim, 3 * mem_dim)
    wfx, bfx = lin(ks[4], ks[5], in_dim, mem_dim)
    wfh, bfh = lin(ks[6], ks[7], mem_dim, mem_dim)
    params = (wioux, bioux, wiouh, biouh, wfx, bfx, wfh, bfh)

    inputs = jax.random.normal(ks[8], (seq, in_dim), jnp.float32)

    # deterministic tree over token indices 0..7:
    #          0
    #        / | \
    #       1  2  7
    #          /\
    #         3  4
    #            /\
    #           5  6
    tree = Tree(0, [Tree(1),
                    Tree(2, [Tree(3),
                             Tree(4, [Tree(5), Tree(6)])]),
                    Tree(7)])

    model = ChildSumTreeLSTMPallas(in_dim, mem_dim, params, n_max=n_max, b_blk=b_blk)
    c, h = model.forward(tree, inputs)
    c = jax.block_until_ready(c)
    h = jax.block_until_ready(h)

    # correctness check against a pure-JAX port of the PyTorch semantics
    c_ref, h_ref = tree_forward_ref(tree, inputs, params, mem_dim)
    assert jnp.allclose(c, c_ref, atol=1e-5, rtol=1e-5), "c mismatch"
    assert jnp.allclose(h, h_ref, atol=1e-5, rtol=1e-5), "h mismatch"

    print("KERNEL_OK")
</pallas_src>

<mosaic_0001>
module attributes {stable_mosaic.version = 11 : i64} {
  func.func @kernel(%arg0: i32, %arg1: memref<8x32xf32, #tpu.memory_space<vmem>>, %arg2: memref<8x8x32xf32, #tpu.memory_space<vmem>>, %arg3: memref<8x8x32xf32, #tpu.memory_space<vmem>>, %arg4: memref<32x128xf32, #tpu.memory_space<vmem>>, %arg5: memref<1x128xf32, #tpu.memory_space<vmem>>, %arg6: memref<32x128xf32, #tpu.memory_space<vmem>>, %arg7: memref<8x64xf32, #tpu.memory_space<vmem>>) attributes {dimension_semantics = [#tpu.dimension_semantics<parallel>], iteration_bounds = array<i64: 1>, scalar_prefetch = 0 : i64, scratch_operands = 0 : i64, tpu.core_type = #tpu.core_type<tc>, window_params = [{transform_indices = @transform_0, window_bounds = array<i64: 8, 32>}, {transform_indices = @transform_1, window_bounds = array<i64: 8, 8, 32>}, {transform_indices = @transform_2, window_bounds = array<i64: 8, 8, 32>}, {pipeline_mode = #tpu.pipeline_mode<synchronous>, transform_indices = @transform_3, window_bounds = array<i64: 32, 128>}, {pipeline_mode = #tpu.pipeline_mode<synchronous>, transform_indices = @transform_4, window_bounds = array<i64: 1, 128>}, {pipeline_mode = #tpu.pipeline_mode<synchronous>, transform_indices = @transform_5, window_bounds = array<i64: 32, 128>}, {transform_indices = @transform_6, window_bounds = array<i64: 8, 64>}]} {
    %c0 = arith.constant 0 : index
    %c0_0 = arith.constant 0 : index
    %0 = vector.load %arg1[%c0, %c0_0] : memref<8x32xf32, #tpu.memory_space<vmem>>, vector<8x32xf32>
    %c0_1 = arith.constant 0 : index
    %c0_2 = arith.constant 0 : index
    %1 = vector.load %arg4[%c0_1, %c0_2] : memref<32x128xf32, #tpu.memory_space<vmem>>, vector<32x128xf32>
    %cst = arith.constant dense<0.000000e+00> : vector<8x128xf32>
    %2 = tpu.matmul %0, %1, %cst {dimension_numbers = #tpu.dot_dimension_numbers<[1], [0], [0], [1], [0, 0, 1, 1], [], []>} : vector<8x32xf32>, vector<32x128xf32>, vector<8x128xf32> -> vector<8x128xf32>
    %c0_3 = arith.constant 0 : index
    %c0_4 = arith.constant 0 : index
    %3 = vector.load %arg5[%c0_3, %c0_4] : memref<1x128xf32, #tpu.memory_space<vmem>>, vector<1x128xf32>
    %4 = vector.broadcast %3 : vector<1x128xf32> to vector<8x128xf32>
    %5 = arith.addf %2, %4 : vector<8x128xf32>
    %c0_5 = arith.constant 0 : index
    %c0_6 = arith.constant 0 : index
    %c0_7 = arith.constant 0 : index
    %6 = vector.load %arg3[%c0_5, %c0_6, %c0_7] : memref<8x8x32xf32, #tpu.memory_space<vmem>>, vector<8x8x32xf32>
    %7 = vector.shape_cast %6 : vector<8x8x32xf32> to vector<64x32xf32>
    %c0_8 = arith.constant 0 : index
    %c0_9 = arith.constant 0 : index
    %8 = vector.load %arg6[%c0_8, %c0_9] : memref<32x128xf32, #tpu.memory_space<vmem>>, vector<32x128xf32>
    %cst_10 = arith.constant dense<0.000000e+00> : vector<64x128xf32>
    %9 = tpu.matmul %7, %8, %cst_10 {dimension_numbers = #tpu.dot_dimension_numbers<[1], [0], [0], [1], [0, 0, 1, 1], [], []>} : vector<64x32xf32>, vector<32x128xf32>, vector<64x128xf32> -> vector<64x128xf32>
    %10 = vector.shape_cast %9 : vector<64x128xf32> to vector<8x8x128xf32>
    %11 = vector.extract_strided_slice %5 {offsets = [0, 0], sizes = [8, 96], strides = [1, 1]} : vector<8x128xf32> to vector<8x96xf32>
    %12 = vector.extract_strided_slice %10 {offsets = [0, 0, 0], sizes = [8, 8, 96], strides = [1, 1, 1]} : vector<8x8x128xf32> to vector<8x8x96xf32>
    %cst_11 = arith.constant dense<0.000000e+00> : vector<8x96xf32>
    %13 = vector.multi_reduction <add>, %12, %cst_11 [1] : vector<8x8x96xf32> to vector<8x96xf32>
    %14 = arith.addf %11, %13 : vector<8x96xf32>
    %15 = vector.extract_strided_slice %14 {offsets = [0, 0], sizes = [8, 32], strides = [1, 1]} : vector<8x96xf32> to vector<8x32xf32>
    %16 = arith.negf %15 : vector<8x32xf32>
    %17 = math.exp %16 : vector<8x32xf32>
    %cst_12 = arith.constant 1.000000e+00 : f32
    %18 = vector.broadcast %cst_12 : f32 to vector<8x32xf32>
    %19 = arith.addf %18, %17 : vector<8x32xf32>
    %20 = arith.divf %18, %19 : vector<8x32xf32>
    %21 = vector.extract_strided_slice %14 {offsets = [0, 32], sizes = [8, 32], strides = [1, 1]} : vector<8x96xf32> to vector<8x32xf32>
    %22 = arith.negf %21 : vector<8x32xf32>
    %23 = math.exp %22 : vector<8x32xf32>
    %cst_13 = arith.constant 1.000000e+00 : f32
    %24 = vector.broadcast %cst_13 : f32 to vector<8x32xf32>
    %25 = arith.addf %24, %23 : vector<8x32xf32>
    %26 = arith.divf %24, %25 : vector<8x32xf32>
    %27 = vector.extract_strided_slice %14 {offsets = [0, 64], sizes = [8, 32], strides = [1, 1]} : vector<8x96xf32> to vector<8x32xf32>
    %28 = math.tanh %27 : vector<8x32xf32>
    %29 = vector.extract_strided_slice %5 {offsets = [0, 96], sizes = [8, 32], strides = [1, 1]} : vector<8x128xf32> to vector<8x32xf32>
    %30 = vector.shape_cast %29 : vector<8x32xf32> to vector<8x1x32xf32>
    %31 = vector.extract_strided_slice %10 {offsets = [0, 0, 96], sizes = [8, 8, 32], strides = [1, 1, 1]} : vector<8x8x128xf32> to vector<8x8x32xf32>
    %32 = vector.broadcast %30 : vector<8x1x32xf32> to vector<8x8x32xf32>
    %33 = arith.addf %31, %32 : vector<8x8x32xf32>
    %34 = arith.negf %33 : vector<8x8x32xf32>
    %35 = math.exp %34 : vector<8x8x32xf32>
    %cst_14 = arith.constant 1.000000e+00 : f32
    %36 = vector.broadcast %cst_14 : f32 to vector<8x8x32xf32>
    %37 = arith.addf %36, %35 : vector<8x8x32xf32>
    %38 = arith.divf %36, %37 : vector<8x8x32xf32>
    %39 = arith.mulf %20, %28 : vector<8x32xf32>
    %c0_15 = arith.constant 0 : index
    %c0_16 = arith.constant 0 : index
    %c0_17 = arith.constant 0 : index
    %40 = vector.load %arg2[%c0_15, %c0_16, %c0_17] : memref<8x8x32xf32, #tpu.memory_space<vmem>>, vector<8x8x32xf32>
    %41 = arith.mulf %38, %40 : vector<8x8x32xf32>
    %cst_18 = arith.constant dense<0.000000e+00> : vector<8x32xf32>
    %42 = vector.multi_reduction <add>, %41, %cst_18 [1] : vector<8x8x32xf32> to vector<8x32xf32>
    %43 = arith.addf %39, %42 : vector<8x32xf32>
    %44 = math.tanh %43 : vector<8x32xf32>
    %45 = arith.mulf %26, %44 : vector<8x32xf32>
    %46 = tpu.concatenate %43, %45 in 1 : vector<8x32xf32>, vector<8x32xf32> -> vector<8x64xf32>
    %c0_19 = arith.constant 0 : index
    %c0_20 = arith.constant 0 : index
    %47 = vector.load %arg7[%c0_19, %c0_20] : memref<8x64xf32, #tpu.memory_space<vmem>>, vector<8x64xf32>
    tpu.vector_store %arg7[%c0_19, %c0_20], %46 {strides = array<i32>} : memref<8x64xf32, #tpu.memory_space<vmem>>, vector<8x64xf32>,
    return
  }
  func.func @transform_0(%arg0: i32) -> (i32, i32) {
    %c0_i32 = arith.constant 0 : i32
    %c0_i32_0 = arith.constant 0 : i32
    return %arg0, %c0_i32 : i32, i32
  }
  func.func @transform_1(%arg0: i32) -> (i32, i32, i32) {
    %c0_i32 = arith.constant 0 : i32
    %c0_i32_0 = arith.constant 0 : i32
    %c0_i32_1 = arith.constant 0 : i32
    return %arg0, %c0_i32, %c0_i32_0 : i32, i32, i32
  }
  func.func @transform_2(%arg0: i32) -> (i32, i32, i32) {
    %c0_i32 = arith.constant 0 : i32
    %c0_i32_0 = arith.constant 0 : i32
    %c0_i32_1 = arith.constant 0 : i32
    return %arg0, %c0_i32, %c0_i32_0 : i32, i32, i32
  }
  func.func @transform_3(%arg0: i32) -> (i32, i32) {
    %c0_i32 = arith.constant 0 : i32
    %c0_i32_0 = arith.constant 0 : i32
    %c0_i32_1 = arith.constant 0 : i32
    return %c0_i32, %c0_i32_0 : i32, i32
  }
  func.func @transform_4(%arg0: i32) -> (i32, i32) {
    %c0_i32 = arith.constant 0 : i32
    %c0_i32_0 = arith.constant 0 : i32
    %c0_i32_1 = arith.constant 0 : i32
    return %c0_i32, %c0_i32_0 : i32, i32
  }
  func.func @transform_5(%arg0: i32) -> (i32, i32) {
    %c0_i32 = arith.constant 0 : i32
    %c0_i32_0 = arith.constant 0 : i32
    %c0_i32_1 = arith.constant 0 : i32
    return %c0_i32, %c0_i32_0 : i32, i32
  }
  func.func @transform_6(%arg0: i32) -> (i32, i32) {
    %c0_i32 = arith.constant 0 : i32
    %c0_i32_0 = arith.constant 0 : i32
    return %arg0, %c0_i32 : i32, i32
  }
}

</mosaic_0001>

<bundles_post_ra>
// kernel: step.1
= control target key start
LH: loop header
LB: loop body
LE: loop exit
PB: predicated region body
PF: predicated region fallthrough
CT: control target
= control target key end

     0   :  { %v758_v0 = vmov 0.0|0.0   ;;  %vm759_vm0 = vmmov 0   ;;  %v760_v4 = vmov 0.0   ;;  %vm35_vm1 = vcmask 261120   ;;  %s761_s16 = smov 96   ;;  %s970_s3 = inlined_call_operand.vmem [shape: f32[32,128], index: 3, kind: input, shape index: {}]   ;;  %s971_s5 = inlined_call_operand.vmem [shape: f32[32,128], index: 5, kind: input, shape index: {}]   ;;  %s972_s2 = inlined_call_operand.vmem [shape: f32[8,8,32], index: 2, kind: input, shape index: {}]   ;;  %s973_s1 = inlined_call_operand.vmem [shape: f32[8,8,32], index: 1, kind: input, shape index: {}]   ;;  %s974_s0 = inlined_call_operand.vmem [shape: f32[8,32], index: 0, kind: input, shape index: {}]   ;;  %s975_s4 = inlined_call_operand.vmem [shape: f32[1,128], index: 4, kind: input, shape index: {}]   ;;  %s976_s6 = inlined_call_operand.vmem [shape: f32[8,64], index: 6, kind: output, shape index: {}]  }
   0x1   :  { %693 = vmatprep.subr.bf16.mxu0 %v758_v0  ;;  %v24_v1 = vld [vmem:[%s970_s3] sm:$0xff]  ;;  %v25_v2 = vld [vmem:[%s970_s3 + $0x8] sm:$0xff]  ;;  %670 = vmatprep.mubr.msk.f32.mxu0 %vm759_vm0, %v760_v4  ;;  %v26_v7 = vld [vmem:[%s970_s3 + $0x10] sm:$0xff]  ;;  %v762_v31 = vmov 1966171168   ;;  %v343_v33 = vlaneseq  ;;  %vm250_vm2 = vcmask 785408  }
   0x2   :  { %v117_v3 = vld [vmem:[%s971_s5] sm:$0xff]  ;;  %v694_v5 = vpack.c.bf16 %v25_v2, %v24_v1  ;;  %v118_v6 = vld [vmem:[%s971_s5 + $0x8] sm:$0xff]  ;;  %v27_v8 = vld [vmem:[%s970_s3 + $0x18] sm:$0xff]  ;;  %v341_v32 = vunpack.c.l.s4 %v762_v31  ;;  %vm315_vm3 = vcmask 1041409   ;;  %vm317_vm4 = vcmask 1042434  }
   0x3   :  { %v699_v9 = vpack.c.bf16 %v118_v6, %v117_v3  ;;  %v119_v10 = vld [vmem:[%s971_s5 + $0x10] sm:$0xff]  ;;  %v120_v11 = vld [vmem:[%s971_s5 + $0x18] sm:$0xff]  ;;  %v697_v12 = vpack.c.bf16 %v27_v8, %v26_v7  ;;  %v489_v15 = vld [vmem:[%s973_s1] sm:$0xff]  ;;  %v344_v35 = vshrl.u32 %v343_v33, 7  ;;  %vm319_vm5 = vcmask 1043459  }
   0x4   :  { %695 = vmatpush3.bf16.msra.mxu0 %v694_v5  ;;  %v703_v13 = vpack.c.bf16 %v120_v11, %v119_v10  ;;  %v111_v14 = vld [vmem:[%s972_s2 + $0x10] sm:$0xff]  ;;  %505 = vrot.lane.b32.xlu0 %v489_v15, %s761_s16  ;;  %v23_v17 = vld [vmem:[%s974_s0] sm:$0xff]  ;;  %v490_v18 = vld [vmem:[%s973_s1 + $0x8] sm:$0xff]  ;;  %v342_v34 = vunpack.c.0.s8 %v341_v32  ;;  %vm321_vm6 = vcmask 1044484   ;;  %vm323_vm7 = vcmask 1045509  }
   0x5   :  { %707 = vmatprep.subr.bf16.mxu1 %v699_v9  ;;  %696 = vmatprep.subr.bf16.mxu0 %v758_v0  ;;  %v491_v16 = vld [vmem:[%s973_s1 + $0x10] sm:$0xff]  ;;  %v109_v19 = vld [vmem:[%s972_s2] sm:$0xff]  ;;  %v112_v20 = vld [vmem:[%s972_s2 + $0x18] sm:$0xff]  ;;  %v902_v55 = vsub.s32 0, %v344_v35  ;;  %vm325_vm8 = vcmask 1046534   ;;  %vm327_vm9 = vcmask 1047559  }
   0x6   :  { %709 = vmatpush3.bf16.msra.mxu1 %v699_v9  ;;  %684 = vmatprep.mubr.msk.f32.mxu1 %vm35_vm1, %v111_v14  ;;  %v113_v21 = vld [vmem:[%s972_s2 + $0x20] sm:$0xff]  ;;  %v492_v22 = vld [vmem:[%s973_s1 + $0x18] sm:$0xff]  ;;  %v114_v24 = vld [vmem:[%s972_s2 + $0x28] sm:$0xff]  ;;  %v345_v37 = vsub.s32 %v342_v34, %v344_v35  ;;  %vm537_vm10 = vcmask 1048320   ;;  %vm620_vm11 = vcmask 523264  }
   0x7   :  { %708 = vmatprep.subr.bf16.mxu1 %v703_v13  ;;  %509 = vrot.lane.b32.xlu1 %v491_v16, %s761_s16  ;;  %v493_v23 = vld [vmem:[%s973_s1 + $0x20] sm:$0xff]  ;;  %v115_v25 = vld [vmem:[%s972_s2 + $0x30] sm:$0xff]  ;;  %v494_v26 = vld [vmem:[%s973_s1 + $0x28] sm:$0xff] }
   0x8   :  { %698 = vmatpush3.bf16.msra.mxu0 %v697_v12  ;;  %507 = vrot.lane.b32.xlu0 %v490_v18, %s761_s16  ;;  %v110_v27 = vld [vmem:[%s972_s2 + $0x8] sm:$0xff]  ;;  %v495_v28 = vld [vmem:[%s973_s1 + $0x30] sm:$0xff]  ;;  %v116_v29 = vld [vmem:[%s972_s2 + $0x38] sm:$0xff] }
   0x9   :  { %700 = vmatprep.subr.bf16.mxu0 %v699_v9  ;;  %v496_v30 = vld [vmem:[%s973_s1 + $0x38] sm:$0xff]  ;;  %v626_v36 = vld [vmem:[%s975_s4] ss:$0 sm:$0xff]  ;;  %s763_s1 = smov 64   ;;  %s764_s4 = smov 32  }
   0xa   :  { %710 = vmatpush3.bf16.msra.mxu1 %v703_v13 }
   0xb   :  { %671 = vmatmul.mubr.msk.f32.vlgmr.msra.gmra.mrb[0].mxu0 %vm35_vm1, %v23_v17  ;;  %511 = vrot.lane.b32.xlu1 %v492_v22, %s761_s16 }
   0xc   :  { %702 = vmatpush3.bf16.msra.mxu0 %v699_v9  ;;  %681 = vmatprep.mubr.msk.f32.mxu0 %vm35_vm1, %v109_v19 }
   0xd   :  { %685 = vmatmul.mubr.msk.f32.vlgmr.msra.gmra.mrb[0].mxu1 %vm35_vm1, %v112_v20  ;;  %704 = vmatprep.subr.bf16.mxu0 %v703_v13 }
   0xe   :  { %687 = vmatprep.mubr.msk.f32.mxu1 %vm35_vm1, %v113_v21  ;;  %513 = vrot.lane.b32.xlu0 %v493_v23, %s761_s16 }
   0xf   :  { %515 = vrot.lane.b32.xlu1 %v494_v26, %s761_s16 }
  0x10   :  { %706 = vmatpush3.bf16.msra.mxu0 %v703_v13 }
  0x11   :  { %688 = vmatmul.mubr.msk.f32.gmra.mrb[2].mxu1 %vm35_vm1, %v114_v24 }
  0x12   :  { %690 = vmatprep.mubr.msk.f32.mxu1 %vm35_vm1, %v115_v25  ;;  %517 = vrot.lane.b32.xlu0 %v495_v28, %s761_s16 }
  0x13   :  { %682 = vmatmul.mubr.msk.f32.vlgmr.msra.gmra.mrb[2].mxu0 %vm35_vm1, %v110_v27  ;;  %519 = vrot.lane.b32.xlu1 %v496_v30, %s761_s16 }
  0x15   :  { %691 = vmatmul.mubr.msk.f32.gmra.mrb[4].mxu1 %vm35_vm1, %v116_v29 }
  0xde   :  { %v105_v38 = vpop.f32.mrb[0].mxu0 }
  0xdf   :  { %v895_v39 = vadd.f32 %v626_v36, %v105_v38  ;;  %v672_v40 = vpop.f32.mrb[1].mxu0 }
  0xe0   :  { %v686_v41 = vpop.f32.mrb[0].mxu1 }
  0xe1   :  { %v339_v42 = vcombine.high %v895_v39, %v895_v39  ;;  %v346_v43 = vrot.slane %v895_v39, %v345_v37  ;;  %v272_v44 = vsel %vm250_vm2, %v686_v41, 0.0  ;;  %v221_v45 = vpop.f32.mrb[1].mxu1 }
  0xe2   :  { %v273_v46 = vrot.slane %v272_v44, 4  ;;  %v265_v47 = vsel %vm250_vm2, %v221_v45, 0.0 }
  0xe3   :  { %v353_v48 = vrot.slane %v339_v42, %v345_v37  ;;  %v354_v49 = vcombine.high %v346_v43, %v346_v43  ;;  %v362_v50 = vrot.slane %v346_v43, %v345_v37  ;;  %v266_v51 = vrot.slane %v265_v47, 4 }
  0xe4   :  { %v274_v52 = vadd.f32 %v273_v46, %v272_v44  ;;  %v689_v53 = vpop.f32.mrb[2].mxu1 }
  0xe5   :  { %v376_v54 = vrot.slane %v354_v49, %v345_v37  ;;  %v384_v56 = vcombine.high %v362_v50, %v362_v50  ;;  %v286_v57 = vsel %vm250_vm2, %v689_v53, 0.0  ;;  %v231_v58 = vpop.f32.mrb[3].mxu1  ;;  %v267_v59 = vadd.f32 %v266_v51, %v265_v47 }
  0xe6   :  { %v287_v60 = vrot.slane %v286_v57, 4  ;;  %v355_v61 = vcombine.high %v353_v48, %v353_v48  ;;  %v279_v62 = vsel %vm250_vm2, %v231_v58, 0.0  ;;  %v683_v63 = vpop.f32.mrb[2].mxu0  ;;  %v275_v0 = vrot.slane %v274_v52, 2 }
  0xe7   :  { %v386_v1 = vcombine.high %v376_v54, %v376_v54  ;;  %v399_v2 = vrot.slane %v384_v56, %v902_v55  ;;  %v211_v3 = vpop.f32.mrb[3].mxu0  ;;  %v280_v5 = vrot.slane %v279_v62, 4  ;;  %v369_v6 = vrot.slane %v353_v48, %v345_v37 }
  0xe8   :  { %v383_v4 = vrot.slane %v355_v61, %v345_v37  ;;  %v692_v7 = vpop.f32.mrb[4].mxu1  ;;  %v288_v10 = vadd.f32 %v287_v60, %v286_v57  ;;  %v268_v12 = vrot.slane %v267_v59, 2  ;;  %v912_v15 = vadd.f32 %v275_v0, %v274_v52 }
  0xe9   :  { %v403_v8 = vrot.slane %v386_v1, %v902_v55  ;;  %v430_v9 = vadd.f32 %v399_v2, %v221_v45  ;;  %v908_v11 = vpop.f32.mrb[5].mxu1  ;;  %v407_v14 = vrot.slane %v369_v6, %v902_v55  ;;  %v281_v19 = vadd.f32 %v280_v5, %v279_v62 }
  0xea   :  { %v411_v13 = vrot.slane %v383_v4, %v902_v55  ;;  %v289_v22 = vrot.slane %v288_v10, 2  ;;  %v914_v23 = vadd.f32 %v268_v12, %v267_v59  ;;  %v258_v26 = vsel %vm250_vm2, %v683_v63, 0.0 }
  0xeb   :  { %v431_v16 = vadd.f32 %v686_v41, %v403_v8  ;;  %v639_v17 = vmul.f32 -1.442695, %v430_v9  ;;  %v432_v20 = vadd.f32 %v407_v14, %v231_v58  ;;  %v277_v27 = vrot.slane %v912_v15, 1  ;;  %v510_v14 = vpop.permute.xlu1 %509 }
  0xec   :  { %v433_v18 = vadd.f32 %v689_v53, %v411_v13  ;;  %v259_v28 = vrot.slane %v258_v26, 4  ;;  %v395_v29 = vrot.slane %v376_v54, %v902_v55  ;;  %v282_v30 = vrot.slane %v281_v19, 2 }
  0xed   :  { %v640_v21 = vmul.f32 -1.442695, %v431_v16  ;;  %718 = vpow2.f32 %v639_v17  ;;  %v641_v25 = vmul.f32 -1.442695, %v432_v20  ;;  %v251_v31 = vsel %vm250_vm2, %v211_v3, 0.0 }
  0xee   :  { %v642_v24 = vmul.f32 -1.442695, %v433_v18  ;;  %v391_v32 = vrot.slane %v362_v50, %v902_v55  ;;  %v921_v33 = vadd.f32 %v289_v22, %v288_v10  ;;  %v260_v34 = vadd.f32 %v259_v28, %v258_v26 }
  0xef   :  { %720 = vpow2.f32 %v640_v21  ;;  %v429_v35 = vadd.f32 %v683_v63, %v395_v29  ;;  %v252_v36 = vrot.slane %v251_v31, 4  ;;  %v300_v38 = vsel %vm250_vm2, %v692_v7, 0.0 }
  0xf0   :  { %722 = vpow2.f32 %v642_v24  ;;  %v428_v37 = vadd.f32 %v391_v32, %v211_v3  ;;  %v387_v40 = vcombine.high %v383_v4, %v383_v4  ;;  %v261_v41 = vrot.slane %v260_v34, 2 }
  0xf1   :  { %724 = vpow2.f32 %v641_v25  ;;  %v638_v42 = vmul.f32 -1.442695, %v429_v35  ;;  %v301_v43 = vrot.slane %v300_v38, 4  ;;  %v293_v44 = vsel %vm250_vm2, %v908_v11, 0.0 }
  0xf2   :  { %v253_v45 = vadd.f32 %v252_v36, %v251_v31  ;;  %v637_v46 = vmul.f32 -1.442695, %v428_v37  ;;  %v419_v47 = vrot.slane %v387_v40, %v902_v55  ;;  %v294_v48 = vrot.slane %v293_v44, 4 }
  0xf3   :  { %v262_v49 = vadd.f32 %v261_v41, %v260_v34  ;;  %726 = vpow2.f32 %v638_v42  ;;  %v302_v50 = vadd.f32 %v301_v43, %v300_v38  ;;  %v385_v51 = vcombine.high %v369_v6, %v369_v6 }
  0xf4   :  { %v254_v52 = vrot.slane %v253_v45, 2  ;;  %728 = vpow2.f32 %v637_v46  ;;  %v435_v53 = vadd.f32 %v692_v7, %v419_v47  ;;  %v295_v54 = vadd.f32 %v294_v48, %v293_v44 }
  0xf5   :  { %v283_v57 = vadd.f32 %v282_v30, %v281_v19  ;;  %v263_v58 = vrot.slane %v262_v49, 1  ;;  %v303_v59 = vrot.slane %v302_v50, 2  ;;  %v415_v60 = vrot.slane %v385_v51, %v902_v55  ;;  %v931_v19 = vpop.permute.xlu0 %505 }
  0xf6   :  { %v255_v62 = vadd.f32 %v254_v52, %v253_v45  ;;  %v644_v63 = vmul.f32 -1.442695, %v435_v53  ;;  %v296_v0 = vrot.slane %v295_v54, 2  ;;  %v270_v2 = vrot.slane %v914_v23, 1 }
  0xf7   :  { %v719_v56 = vpop.eup %718  ;;  %v264_v3 = vadd.f32 %v263_v58, %v262_v49  ;;  %v304_v4 = vadd.f32 %v303_v59, %v302_v50  ;;  %v434_v5 = vadd.f32 %v415_v60, %v908_v11  ;;  %v284_v13 = vrot.slane %v283_v57, 1 }
  0xf8   :  { %v462_v61 = vadd.f32 1.0, %v719_v56  ;;  %v256_v8 = vrot.slane %v255_v62, 1  ;;  %v297_v9 = vadd.f32 %v296_v0, %v295_v54  ;;  %v291_v16 = vrot.slane %v921_v33, 1 }
  0xf9   :  { %v721_v1 = vpop.eup %720  ;;  %v643_v55 = vmul.f32 -1.442695, %v434_v5  ;;  %v271_v11 = vadd.f32 %v270_v2, %v914_v23  ;;  %v278_v21 = vadd.f32 %v277_v27, %v912_v15  ;;  %v305_v24 = vrot.slane %v304_v4, 1  ;;  %v512_v27 = vpop.permute.xlu1 %511 }
  0xfa   :  { %v723_v6 = vpop.eup %722  ;;  %v463_v7 = vadd.f32 1.0, %v721_v1  ;;  %730 = vrcp.f32 %v462_v61  ;;  %v257_v18 = vadd.f32 %v256_v8, %v255_v62  ;;  %v298_v20 = vrot.slane %v297_v9, 1  ;;  %v508_v37 = vpop.permute.xlu0 %507 }
  0xfb   :  { %v725_v10 = vpop.eup %724  ;;  %v465_v12 = vadd.f32 1.0, %v723_v6  ;;  %732 = vpow2.f32 %v644_v63  ;;  %v285_v26 = vadd.f32 %v284_v13, %v283_v57  ;;  %v292_v23 = vadd.f32 %v291_v16, %v921_v33 }
  0xfc   :  { %734 = vrcp.f32 %v463_v7  ;;  %v464_v17 = vadd.f32 1.0, %v725_v10  ;;  %v316_v22 = vsel %vm315_vm3, %v264_v3, %v257_v18  ;;  %v299_v34 = vadd.f32 %v298_v20, %v297_v9 }
  0xfd   :  { %736 = vrcp.f32 %v465_v12  ;;  %v727_v25 = vpop.eup %726  ;;  %v318_v28 = vsel %vm317_vm4, %v271_v11, %v316_v22  ;;  %v306_v35 = vadd.f32 %v305_v24, %v304_v4  ;;  %v516_v49 = vpop.permute.xlu1 %515 }
  0xfe   :  { %738 = vrcp.f32 %v464_v17  ;;  %v729_v29 = vpop.eup %728  ;;  %v461_v30 = vadd.f32 1.0, %v727_v25  ;;  %v320_v31 = vsel %vm319_vm5, %v278_v21, %v318_v28  ;;  %v514_v52 = vpop.permute.xlu0 %513 }
  0xff   :  { %740 = vpow2.f32 %v643_v55  ;;  %v460_v32 = vadd.f32 1.0, %v729_v29  ;;  %v322_v15 = vsel %vm321_vm6, %v285_v26, %v320_v31 }
 0x100   :  { %742 = vrcp.f32 %v461_v30  ;;  %v324_v36 = vsel %vm323_vm7, %v292_v23, %v322_v15 }
 0x101   :  { %744 = vrcp.f32 %v460_v32  ;;  %v326_v38 = vsel %vm325_vm8, %v299_v34, %v324_v36  ;;  %v520_v13 = vpop.permute.xlu1 %519 }
 0x102   :  { %v328_v33 = vsel %vm327_vm9, %v306_v35, %v326_v38  ;;  %v518_v25 = vpop.permute.xlu0 %517 }
 0x103   :  { %v946_v42 = vadd.f32 %v328_v33, %v895_v39 }
 0x104   :  { %v731_v40 = vpop.eup %730 }
 0x105   :  { %v733_v41 = vpop.eup %732  ;;  %v531_v43 = vmul.f32 %v731_v40, %v510_v14  ;;  %746 = vtanh.f32 %v946_v42 }
 0x106   :  { %v735_v44 = vpop.eup %734  ;;  %v467_v45 = vadd.f32 1.0, %v733_v41 }
 0x107   :  { %v737_v46 = vpop.eup %736  ;;  %v552_v47 = vsel %vm537_vm10, %v531_v43, 0.0  ;;  %v532_v48 = vmul.f32 %v735_v44, %v512_v27 }
 0x108   :  { %v739_v50 = vpop.eup %738  ;;  %748 = vrcp.f32 %v467_v45  ;;  %v553_v51 = vrot.slane %v552_v47, 4  ;;  %v534_v53 = vmul.f32 %v737_v46, %v516_v49 }
 0x109   :  { %v741_v54 = vpop.eup %740  ;;  %v559_v56 = vsel %vm537_vm10, %v532_v48, 0.0  ;;  %v533_v39 = vmul.f32 %v739_v50, %v514_v52 }
 0x10a   :  { %v466_v57 = vadd.f32 1.0, %v741_v54  ;;  %v554_v58 = vadd.f32 %v553_v51, %v552_v47  ;;  %v560_v59 = vrot.slane %v559_v56, 4  ;;  %v573_v60 = vsel %vm537_vm10, %v534_v53, 0.0  ;;  %v743_v63 = vpop.eup %742 }
 0x10b   :  { %v566_v61 = vsel %vm537_vm10, %v533_v39, 0.0  ;;  %v574_v62 = vrot.slane %v573_v60, 4  ;;  %v745_v2 = vpop.eup %744  ;;  %v530_v4 = vmul.f32 %v743_v63, %v508_v37 }
 0x10c   :  { %750 = vrcp.f32 %v466_v57  ;;  %v561_v0 = vadd.f32 %v560_v59, %v559_v56  ;;  %v567_v1 = vrot.slane %v566_v61, 4  ;;  %v555_v3 = vrot.slane %v554_v58, 2 }
 0x10d   :  { %v529_v5 = vmul.f32 %v745_v2, %v931_v19  ;;  %v545_v7 = vsel %vm537_vm10, %v530_v4, 0.0  ;;  %v575_v9 = vadd.f32 %v574_v62, %v573_v60  ;;  %v636_v2 = vmul.f32 -1.442695, %v946_v42 }
 0x10e   :  { %v568_v6 = vadd.f32 %v567_v1, %v566_v61  ;;  %v562_v8 = vrot.slane %v561_v0, 2  ;;  %v546_v12 = vrot.slane %v545_v7, 4  ;;  %v556_v16 = vadd.f32 %v555_v3, %v554_v58 }
 0x10f   :  { %v538_v10 = vsel %vm537_vm10, %v529_v5, 0.0  ;;  %v747_v55 = vpop.eup %746  ;;  %v576_v19 = vrot.slane %v575_v9, 2  ;;  %752 = vpow2.f32 %v636_v2 }
 0x110   :  { %v539_v14 = vrot.slane %v538_v10, 4  ;;  %v547_v18 = vadd.f32 %v546_v12, %v545_v7  ;;  %v569_v11 = vrot.slane %v568_v6, 2  ;;  %485 = vrot.lane.b32.xlu0 %v747_v55, %s763_s1  ;;  %v563_v21 = vadd.f32 %v562_v8, %v561_v0 }
 0x111   :  { %v557_v28 = vrot.slane %v556_v16, 1  ;;  %v577_v27 = vadd.f32 %v576_v19, %v575_v9 }
 0x112   :  { %v749_v17 = vpop.eup %748  ;;  %v540_v20 = vadd.f32 %v539_v14, %v538_v10  ;;  %v548_v24 = vrot.slane %v547_v18, 2  ;;  %v570_v31 = vadd.f32 %v569_v11, %v568_v6  ;;  %v564_v15 = vrot.slane %v563_v21, 1 }
 0x113   :  { %v536_v22 = vmul.f32 %v749_v17, %v520_v13  ;;  %v558_v40 = vadd.f32 %v557_v28, %v556_v16  ;;  %v578_v48 = vrot.slane %v577_v27, 1 }
 0x114   :  { %v541_v26 = vrot.slane %v540_v20, 2  ;;  %v549_v30 = vadd.f32 %v548_v24, %v547_v18  ;;  %v571_v43 = vrot.slane %v570_v31, 1  ;;  %v565_v47 = vadd.f32 %v564_v15, %v563_v21 }
 0x115   :  { %v587_v29 = vsel %vm537_vm10, %v536_v22, 0.0  ;;  %v579_v56 = vadd.f32 %v578_v48, %v577_v27 }
 0x116   :  { %v751_v23 = vpop.eup %750  ;;  %v588_v32 = vrot.slane %v587_v29, 4  ;;  %v542_v34 = vadd.f32 %v541_v26, %v540_v20  ;;  %v550_v36 = vrot.slane %v549_v30, 1  ;;  %v572_v52 = vadd.f32 %v571_v43, %v570_v31 }
 0x117   :  { %v535_v35 = vmul.f32 %v751_v23, %v518_v25 }
 0x118   :  { %v589_v37 = vadd.f32 %v588_v32, %v587_v29  ;;  %v543_v38 = vrot.slane %v542_v34, 1  ;;  %v551_v41 = vadd.f32 %v550_v36, %v549_v30 }
 0x119   :  { %v580_v33 = vsel %vm537_vm10, %v535_v35, 0.0  ;;  %v753_v3 = vpop.eup %752 }
 0x11a   :  { %v581_v44 = vrot.slane %v580_v33, 4  ;;  %v590_v45 = vrot.slane %v589_v37, 2  ;;  %v544_v46 = vadd.f32 %v543_v38, %v542_v34  ;;  %v334_v4 = vadd.f32 1.0, %v753_v3 }
 0x11c   :  { %v582_v49 = vadd.f32 %v581_v44, %v580_v33  ;;  %v602_v50 = vsel %vm315_vm3, %v551_v41, %v544_v46  ;;  %v591_v51 = vadd.f32 %v590_v45, %v589_v37  ;;  %754 = vrcp.f32 %v334_v4 }
 0x11d   :  { %v603_v54 = vsel %vm317_vm4, %v558_v40, %v602_v50 }
 0x11e   :  { %v583_v53 = vrot.slane %v582_v49, 2  ;;  %v604_v39 = vsel %vm319_vm5, %v565_v47, %v603_v54  ;;  %v592_v59 = vrot.slane %v591_v51, 1 }
 0x11f   :  { %v605_v58 = vsel %vm321_vm6, %v572_v52, %v604_v39 }
 0x120   :  { %v584_v57 = vadd.f32 %v583_v53, %v582_v49  ;;  %v606_v60 = vsel %vm323_vm7, %v579_v56, %v605_v58  ;;  %v593_v63 = vadd.f32 %v592_v59, %v591_v51 }
 0x122   :  { %v585_v61 = vrot.slane %v584_v57, 1 }
 0x124   :  { %v586_v62 = vadd.f32 %v585_v61, %v584_v57 }
 0x126   :  { %v607_v0 = vsel %vm325_vm8, %v586_v62, %v606_v60  ;;  %v755_v6 = vpop.eup %754 }
 0x127   :  { %v608_v1 = vsel %vm327_vm9, %v593_v63, %v607_v0 }
 0x128   :  { %609 = vrot.lane.b32.xlu1 %v608_v1, %s764_s4 }
 0x182   :  { %v486_v5 = vpop.permute.xlu0 %485 }
 0x183   :  { %v488_v7 = vmul.f32 %v755_v6, %v486_v5 }
 0x19a   :  { %v610_v8 = vpop.permute.xlu1 %609 }
 0x19b   :  { %v612_v9 = vadd.f32 %v610_v8, %v488_v7 }
 0x19d   :  { %756 = vtanh.f32 %v612_v9 }
 0x1a7   :  { %v757_v10 = vpop.eup %756 }
 0x1a8   :  { %615 = vrot.lane.b32.xlu0 %v757_v10, %s764_s4 }
 0x21a   :  { %v616_v12 = vpop.permute.xlu0 %615 }
 0x21b   :  { %v618_v13 = vmul.f32 %v755_v6, %v616_v12 }
 0x21d   :  { %v619_v55 = vsel %vm35_vm1, %v612_v9, %v618_v13 }
 0x21e   :  { %621 = vst.msk [vmem:[%s976_s6] sm:$0xff] %vm620_vm11, %v619_v55 }

</bundles_post_ra>
